<compile_context>
chip_gen: v6e
topology: v6e:2x2x1
jax: 0.10.0
libtpu: 0.0.40
codegen_flags: <defaults>
</compile_context>

<pallas_src>
import functools

import jax
import jax.numpy as jnp
from jax.experimental import pallas as pl
from jax.experimental.pallas import tpu as pltpu


# ----------------------------------------------------------------------------
# Small helpers
# ----------------------------------------------------------------------------
def _round_up(n, m):
    return ((n + m - 1) // m) * m


def _cdiv(a, b):
    return (a + b - 1) // b


def _device_kind():
    try:
        return jax.devices()[0].device_kind.lower()
    except Exception:  # pragma: no cover - no devices at trace time
        return ""


def _eup_supports_bf16():
    """bf16 EUP (tanh) exists on v6e/v7x; keep f32 tanh on v5e/v5p/v4."""
    kind = _device_kind()
    return any(t in kind for t in ("v6", "v7"))


def _num_parallel_cores():
    """Parts where a "parallel" grid axis is sharded across 2 TensorCores."""
    kind = _device_kind()
    return 2 if any(t in kind for t in ("v7", "v4", "v5p")) else 1


def _batch_tiling(batch, max_tile, min_steps):
    """Pick a lane-dim (batch) tile and the padded batch it divides.

    Single grid step: tile == padded batch (block equals full array, so no
    128-divisibility requirement).  Multi-step: tile is a multiple of 128
    (the batch is the lane dim now).  When min_steps > 1 (2-TC parts) we only
    force the split if each step still gets >= 128 lanes.
    """
    padded = _round_up(max(batch, 1), 8)
    if min_steps > 1 and padded >= min_steps * 128:
        max_tile = min(max_tile, _round_up(_cdiv(padded, min_steps), 128))
    if padded <= max_tile:
        return padded, padded
    tile = max(128, (max_tile // 128) * 128)
    padded = _round_up(padded, tile)
    return padded, tile


# ----------------------------------------------------------------------------
# Kernels (feature-major: activations are [features, batch_tile])
# ----------------------------------------------------------------------------
def _mlp_kernel(x_ref, w1_ref, b1_ref, w2_ref, b2_ref, w3_ref, b3_ref, o_ref,
                *, tanh_dtype):
    """is_opp=False: Linear -> tanh -> Linear -> tanh -> Linear.

    x_ref: [in_dim, tile]; w*: torch [out, in]; b*: [out, 1]; o_ref: [out, tile].
    MXU operands in w1_ref.dtype (f32 or bf16), f32 accumulation.  tanh runs in
    tanh_dtype (bf16 only on parts with a bf16 EUP).
    """
    wdt = w1_ref.dtype
    x = x_ref[...].astype(wdt)
    h = jnp.dot(w1_ref[...], x, preferred_element_type=jnp.float32) + b1_ref[...]
    h = jnp.tanh(h.astype(tanh_dtype)).astype(wdt)
    h = jnp.dot(w2_ref[...], h, preferred_element_type=jnp.float32) + b2_ref[...]
    h = jnp.tanh(h.astype(tanh_dtype)).astype(wdt)
    o = jnp.dot(w3_ref[...], h, preferred_element_type=jnp.float32) + b3_ref[...]
    o_ref[...] = o.astype(o_ref.dtype)


def _opp_mix_kernel(x_ref, w1_ref, b1_ref, w2_ref, b2_ref, w3_ref, b3_ref, o_ref):
    """is_opp=True: per-row convex mix of two Linear stacks, fused a/b matmuls.

    Packed weights (see pack_opp_params): w1 is [2H, in_dim] with a ZERO first
    column so the full input (whose feature row 0 is the mix weight) feeds the
    MXU directly; w2 is [2H, H]; w3 is [2O, H]; biases [2*out, 1].  Each layer
    is ONE matmul producing [2*width, tile]; halves are split along sublanes
    (8-aligned offsets -> free views) and mixed as a + w1*(b - a).
    The mix row is read in f32 BEFORE any bf16 cast — keep that coupled with
    the zero-column trick.
    """
    wdt = w1_ref.dtype
    v = x_ref[...]                       # [in_dim, tile] f32
    tile = v.shape[1]
    H = w2_ref.shape[1]
    O = o_ref.shape[0]

    wg = v[0:1, :]                       # [1, tile] mix weight, f32
    # Hoisted broadcasts (JAX does not CSE broadcast_in_dim).
    wg_h = jnp.broadcast_to(wg, (H, tile))
    wg_o = jnp.broadcast_to(wg, (O, tile))

    h2 = jnp.dot(w1_ref[...], v.astype(wdt),
                 preferred_element_type=jnp.float32) + b1_ref[...]
    a, b = h2[:H], h2[H:]
    h = a + wg_h * (b - a)

    h2 = jnp.dot(w2_ref[...], h.astype(wdt),
                 preferred_element_type=jnp.float32) + b2_ref[...]
    a, b = h2[:H], h2[H:]
    h = a + wg_h * (b - a)

    h2 = jnp.dot(w3_ref[...], h.astype(wdt),
                 preferred_element_type=jnp.float32) + b3_ref[...]
    a, b = h2[:O], h2[O:]
    o_ref[...] = (a + wg_o * (b - a)).astype(o_ref.dtype)


# ----------------------------------------------------------------------------
# Batched pallas_call wrapper (1-D grid over the batch = lane dim)
# ----------------------------------------------------------------------------
def _batched_call(kernel, x_t, weights, biases, out_dim, tile_m):
    in_dim, batch = x_t.shape
    padded, tile = _batch_tiling(batch, tile_m, _num_parallel_cores())
    if padded != batch:
        x_t = jnp.pad(x_t, ((0, 0), (0, padded - batch)))
    grid = (padded // tile,)

    def resident(arr):
        # Whole array, same block every grid step -> DMA'd once, VMEM-resident.
        return pl.BlockSpec(arr.shape, lambda i: (0, 0))

    args = [x_t]
    in_specs = [pl.BlockSpec((in_dim, tile), lambda i: (0, i))]
    for w, b in zip(weights, biases):
        args += [w, b]
        in_specs += [resident(w), resident(b)]

    out = pl.pallas_call(
        kernel,
        out_shape=jax.ShapeDtypeStruct((out_dim, padded), jnp.float32),
        grid=grid,
        in_specs=in_specs,
        out_specs=pl.BlockSpec((out_dim, tile), lambda i: (0, i)),
        compiler_params=pltpu.CompilerParams(
            dimension_semantics=("parallel",)),
    )(*args)
    return out[:, :batch]


def _forward_mlp_t(x_t, packed, tile_m):
    out_dim = packed["w3"].shape[0]
    wdt = packed["w1"].dtype
    tanh_dtype = (jnp.bfloat16
                  if (wdt == jnp.bfloat16 and _eup_supports_bf16())
                  else jnp.float32)
    kernel = functools.partial(_mlp_kernel, tanh_dtype=tanh_dtype)
    return _batched_call(
        kernel, x_t,
        (packed["w1"], packed["w2"], packed["w3"]),
        (packed["b1"], packed["b2"], packed["b3"]),
        out_dim, tile_m)


def _forward_opp_t(x_t, packed, tile_m):
    out_dim = packed["w3"].shape[0] // 2
    return _batched_call(
        _opp_mix_kernel, x_t,
        (packed["w1"], packed["w2"], packed["w3"]),
        (packed["b1"], packed["b2"], packed["b3"]),
        out_dim, tile_m)


# ---- Preferred, lane-dense entry points: x_t is [in_dim, batch] --------------
@functools.partial(jax.jit, static_argnames=("tile_m",))
def value_net_forward_t(x_t, packed, *, tile_m=4096):
    """is_opp=False.  Returns [out_dim, batch]."""
    return _forward_mlp_t(x_t, packed, tile_m)


@functools.partial(jax.jit, static_argnames=("tile_m",))
def value_net_forward_opp_t(x_t, packed, *, tile_m=4096):
    """is_opp=True.  Returns [out_dim, batch]."""
    return _forward_opp_t(x_t, packed, tile_m)


# ---- Module-layout convenience wrappers: x is [batch, in_dim] ----------------
# NOTE: these pay one extra pass over x (transpose) plus a tiny output
# transpose; feed value_net_forward*_t directly if the producer can emit
# feature-major data.
@functools.partial(jax.jit, static_argnames=("tile_m",))
def value_net_forward(x, packed, *, tile_m=4096):
    return _forward_mlp_t(x.T, packed, tile_m).T


@functools.partial(jax.jit, static_argnames=("tile_m",))
def value_net_forward_opp(x, packed, *, tile_m=4096):
    return _forward_opp_t(x.T, packed, tile_m).T


# ----------------------------------------------------------------------------
# One-time parameter packing (outside the per-call hot path)
# ----------------------------------------------------------------------------
def pack_params(params, compute_dtype=jnp.float32):
    """is_opp=False: torch [out, in] weights, [out, 1] f32 biases."""
    return dict(
        w1=params["w1"].astype(compute_dtype),
        w2=params["w2"].astype(compute_dtype),
        w3=params["w3"].astype(compute_dtype),
        b1=params["b1"].reshape(-1, 1).astype(jnp.float32),
        b2=params["b2"].reshape(-1, 1).astype(jnp.float32),
        b3=params["b3"].reshape(-1, 1).astype(jnp.float32),
    )


def pack_opp_params(params, compute_dtype=jnp.float32):
    """is_opp=True: concat a/b branches along OUT (one matmul per layer) and
    prepend a ZERO input column to layer 1 so the full input (mix weight at
    feature index 0) can feed the MXU directly.  The zero column and the
    in-kernel f32 read of the mix row are coupled — don't remove one without
    the other (the bf16 path would otherwise leak a rounded mix value)."""
    H = params["w1a"].shape[0]
    zero_col = jnp.zeros((H, 1), params["w1a"].dtype)
    w1 = jnp.concatenate([
        jnp.concatenate([zero_col, params["w1a"]], axis=1),
        jnp.concatenate([zero_col, params["w1b"]], axis=1)], axis=0)
    w2 = jnp.concatenate([params["w2a"], params["w2b"]], axis=0)
    w3 = jnp.concatenate([params["w3a"], params["w3b"]], axis=0)
    b1 = jnp.concatenate([params["b1a"], params["b1b"]], axis=0).reshape(-1, 1)
    b2 = jnp.concatenate([params["b2a"], params["b2b"]], axis=0).reshape(-1, 1)
    b3 = jnp.concatenate([params["b3a"], params["b3b"]], axis=0).reshape(-1, 1)
    return dict(
        w1=w1.astype(compute_dtype), w2=w2.astype(compute_dtype),
        w3=w3.astype(compute_dtype),
        b1=b1.astype(jnp.float32), b2=b2.astype(jnp.float32),
        b3=b3.astype(jnp.float32),
    )


# ----------------------------------------------------------------------------
# Deterministic parameter init (shapes from ValueNet.__init__, torch layout)
# ----------------------------------------------------------------------------
def _init_linear(key, in_dim, out_dim):
    kw, kb = jax.random.split(key)
    bound = 1.0 / (in_dim ** 0.5)
    w = jax.random.uniform(kw, (out_dim, in_dim), jnp.float32, -bound, bound)
    b = jax.random.uniform(kb, (out_dim,), jnp.float32, -bound, bound)
    return w, b


def make_params(key, input_dim, hidden_dim, output_dim, is_opp):
    if not is_opp:
        k1, k2, k3 = jax.random.split(key, 3)
        w1, b1 = _init_linear(k1, input_dim, hidden_dim)
        w2, b2 = _init_linear(k2, hidden_dim, hidden_dim)
        w3, b3 = _init_linear(k3, hidden_dim, output_dim)
        return dict(w1=w1, b1=b1, w2=w2, b2=b2, w3=w3, b3=b3)
    keys = jax.random.split(key, 6)
    w1a, b1a = _init_linear(keys[0], input_dim - 1, hidden_dim)
    w1b, b1b = _init_linear(keys[1], input_dim - 1, hidden_dim)
    w2a, b2a = _init_linear(keys[2], hidden_dim, hidden_dim)
    w2b, b2b = _init_linear(keys[3], hidden_dim, hidden_dim)
    w3a, b3a = _init_linear(keys[4], hidden_dim, output_dim)
    w3b, b3b = _init_linear(keys[5], hidden_dim, output_dim)
    return dict(w1a=w1a, b1a=b1a, w1b=w1b, b1b=b1b,
                w2a=w2a, b2a=b2a, w2b=w2b, b2b=b2b,
                w3a=w3a, b3a=b3a, w3b=w3b, b3b=b3b)


# ----------------------------------------------------------------------------
# Pure-JAX references (mirror the PyTorch forward exactly; torch [out,in] w)
# ----------------------------------------------------------------------------
def ref_forward(x, p):
    h = jnp.tanh(x @ p["w1"].T + p["b1"])
    h = jnp.tanh(h @ p["w2"].T + p["b2"])
    return h @ p["w3"].T + p["b3"]


def ref_forward_opp(x, p):
    w1 = x[:, 0:1]
    w0 = 1.0 - w1
    z = x[:, 1:]
    h = w0 * (z @ p["w1a"].T + p["b1a"]) + w1 * (z @ p["w1b"].T + p["b1b"])
    h = w0 * (h @ p["w2a"].T + p["b2a"]) + w1 * (h @ p["w2b"].T + p["b2b"])
    return w0 * (h @ p["w3a"].T + p["b3a"]) + w1 * (h @ p["w3b"].T + p["b3b"])


if __name__ == "__main__":
    input_dim, hidden_dim, output_dim = 16, 32, 8
    batch = 8

    key = jax.random.PRNGKey(0)
    kx, kp0, kp1, kx2 = jax.random.split(key, 4)
    x = jax.random.normal(kx, (batch, input_dim), jnp.float32)

    # ----- is_opp = False (f32 path, module layout wrapper) -----
    raw = make_params(kp0, input_dim, hidden_dim, output_dim, is_opp=False)
    packed = pack_params(raw)
    out = value_net_forward(x, packed)
    jax.block_until_ready(out)
    ref = ref_forward(x, raw)
    assert out.shape == (batch, output_dim)
    assert jnp.allclose(out, ref, atol=1e-4, rtol=1e-4), "is_opp=False mismatch"

    # ----- is_opp = True (f32 path; column 0 is the mix weight in [0,1]) -----
    raw_opp = make_params(kp1, input_dim, hidden_dim, output_dim, is_opp=True)
    packed_opp = pack_opp_params(raw_opp)
    x_opp = x.at[:, 0].set(jax.nn.sigmoid(x[:, 0]))
    out_opp = value_net_forward_opp(x_opp, packed_opp)
    jax.block_until_ready(out_opp)
    ref_opp = ref_forward_opp(x_opp, raw_opp)
    assert out_opp.shape == (batch, output_dim)
    assert jnp.allclose(out_opp, ref_opp, atol=1e-4, rtol=1e-4), "is_opp=True mismatch"

    # ----- bigger batch: padding + grid > 1 + lane-dense pre-transposed entry -----
    big = 300
    xb = jax.random.normal(kx2, (big, input_dim), jnp.float32)
    out_b_t = value_net_forward_t(xb.T, packed, tile_m=128)   # forces grid > 1
    jax.block_until_ready(out_b_t)
    assert out_b_t.shape == (output_dim, big)
    assert jnp.allclose(out_b_t.T, ref_forward(xb, raw), atol=1e-4, rtol=1e-4), \
        "tiled-batch mismatch"

    # ----- bf16 MXU-operand path (bf16 tanh only where the EUP supports it) -----
    packed_bf = pack_params(raw, compute_dtype=jnp.bfloat16)
    out_bf = value_net_forward(x, packed_bf)
    jax.block_until_ready(out_bf)
    assert jnp.allclose(out_bf, ref, atol=1e-1, rtol=1e-1), "bf16 mlp mismatch"

    packed_opp_bf = pack_opp_params(raw_opp, compute_dtype=jnp.bfloat16)
    out_opp_bf = value_net_forward_opp(x_opp, packed_opp_bf)
    jax.block_until_ready(out_opp_bf)
    assert jnp.allclose(out_opp_bf, ref_opp, atol=1e-1, rtol=1e-1), "bf16 opp mismatch"

    print("KERNEL_OK")
</pallas_src>

<mosaic_0001>
module attributes {stable_mosaic.version = 11 : i64} {
  func.func @_mlp_kernel(%arg0: i32, %arg1: memref<16x8xf32, #tpu.memory_space<vmem>>, %arg2: memref<32x16xf32, #tpu.memory_space<vmem>>, %arg3: memref<32x1xf32, #tpu.memory_space<vmem>>, %arg4: memref<32x32xf32, #tpu.memory_space<vmem>>, %arg5: memref<32x1xf32, #tpu.memory_space<vmem>>, %arg6: memref<8x32xf32, #tpu.memory_space<vmem>>, %arg7: memref<8x1xf32, #tpu.memory_space<vmem>>, %arg8: memref<8x8xf32, #tpu.memory_space<vmem>>) attributes {dimension_semantics = [#tpu.dimension_semantics<parallel>], iteration_bounds = array<i64: 1>, scalar_prefetch = 0 : i64, scratch_operands = 0 : i64, tpu.core_type = #tpu.core_type<tc>, window_params = [{transform_indices = @transform_0, window_bounds = array<i64: 16, 8>}, {pipeline_mode = #tpu.pipeline_mode<synchronous>, transform_indices = @transform_1, window_bounds = array<i64: 32, 16>}, {pipeline_mode = #tpu.pipeline_mode<synchronous>, transform_indices = @transform_2, window_bounds = array<i64: 32, 1>}, {pipeline_mode = #tpu.pipeline_mode<synchronous>, transform_indices = @transform_3, window_bounds = array<i64: 32, 32>}, {pipeline_mode = #tpu.pipeline_mode<synchronous>, transform_indices = @transform_4, window_bounds = array<i64: 32, 1>}, {pipeline_mode = #tpu.pipeline_mode<synchronous>, transform_indices = @transform_5, window_bounds = array<i64: 8, 32>}, {pipeline_mode = #tpu.pipeline_mode<synchronous>, transform_indices = @transform_6, window_bounds = array<i64: 8, 1>}, {transform_indices = @transform_7, window_bounds = array<i64: 8, 8>}]} {
    %c0 = arith.constant 0 : index
    %c0_0 = arith.constant 0 : index
    %0 = vector.load %arg1[%c0, %c0_0] : memref<16x8xf32, #tpu.memory_space<vmem>>, vector<16x8xf32>
    %c0_1 = arith.constant 0 : index
    %c0_2 = arith.constant 0 : index
    %1 = vector.load %arg2[%c0_1, %c0_2] : memref<32x16xf32, #tpu.memory_space<vmem>>, vector<32x16xf32>
    %cst = arith.constant dense<0.000000e+00> : vector<32x8xf32>
    %2 = tpu.matmul %1, %0, %cst {dimension_numbers = #tpu.dot_dimension_numbers<[1], [0], [0], [1], [0, 0, 1, 1], [], []>} : vector<32x16xf32>, vector<16x8xf32>, vector<32x8xf32> -> vector<32x8xf32>
    %c0_3 = arith.constant 0 : index
    %c0_4 = arith.constant 0 : index
    %3 = vector.load %arg3[%c0_3, %c0_4] : memref<32x1xf32, #tpu.memory_space<vmem>>, vector<32x1xf32>
    %4 = vector.broadcast %3 : vector<32x1xf32> to vector<32x8xf32>
    %5 = arith.addf %2, %4 : vector<32x8xf32>
    %6 = math.tanh %5 : vector<32x8xf32>
    %c0_5 = arith.constant 0 : index
    %c0_6 = arith.constant 0 : index
    %7 = vector.load %arg4[%c0_5, %c0_6] : memref<32x32xf32, #tpu.memory_space<vmem>>, vector<32x32xf32>
    %cst_7 = arith.constant dense<0.000000e+00> : vector<32x8xf32>
    %8 = tpu.matmul %7, %6, %cst_7 {dimension_numbers = #tpu.dot_dimension_numbers<[1], [0], [0], [1], [0, 0, 1, 1], [], []>} : vector<32x32xf32>, vector<32x8xf32>, vector<32x8xf32> -> vector<32x8xf32>
    %c0_8 = arith.constant 0 : index
    %c0_9 = arith.constant 0 : index
    %9 = vector.load %arg5[%c0_8, %c0_9] : memref<32x1xf32, #tpu.memory_space<vmem>>, vector<32x1xf32>
    %10 = vector.broadcast %9 : vector<32x1xf32> to vector<32x8xf32>
    %11 = arith.addf %8, %10 : vector<32x8xf32>
    %12 = math.tanh %11 : vector<32x8xf32>
    %c0_10 = arith.constant 0 : index
    %c0_11 = arith.constant 0 : index
    %13 = vector.load %arg6[%c0_10, %c0_11] : memref<8x32xf32, #tpu.memory_space<vmem>>, vector<8x32xf32>
    %cst_12 = arith.constant dense<0.000000e+00> : vector<8x8xf32>
    %14 = tpu.matmul %13, %12, %cst_12 {dimension_numbers = #tpu.dot_dimension_numbers<[1], [0], [0], [1], [0, 0, 1, 1], [], []>} : vector<8x32xf32>, vector<32x8xf32>, vector<8x8xf32> -> vector<8x8xf32>
    %c0_13 = arith.constant 0 : index
    %c0_14 = arith.constant 0 : index
    %15 = vector.load %arg7[%c0_13, %c0_14] : memref<8x1xf32, #tpu.memory_space<vmem>>, vector<8x1xf32>
    %16 = vector.broadcast %15 : vector<8x1xf32> to vector<8x8xf32>
    %17 = arith.addf %14, %16 : vector<8x8xf32>
    %c0_15 = arith.constant 0 : index
    %c0_16 = arith.constant 0 : index
    %18 = vector.load %arg8[%c0_15, %c0_16] : memref<8x8xf32, #tpu.memory_space<vmem>>, vector<8x8xf32>
    tpu.vector_store %arg8[%c0_15, %c0_16], %17 {strides = array<i32>} : memref<8x8xf32, #tpu.memory_space<vmem>>, vector<8x8xf32>,
    return
  }
  func.func @transform_0(%arg0: i32) -> (i32, i32) {
    %c0_i32 = arith.constant 0 : i32
    %c0_i32_0 = arith.constant 0 : i32
    return %c0_i32, %arg0 : i32, i32
  }
  func.func @transform_1(%arg0: i32) -> (i32, i32) {
    %c0_i32 = arith.constant 0 : i32
    %c0_i32_0 = arith.constant 0 : i32
    %c0_i32_1 = arith.constant 0 : i32
    return %c0_i32, %c0_i32_0 : i32, i32
  }
  func.func @transform_2(%arg0: i32) -> (i32, i32) {
    %c0_i32 = arith.constant 0 : i32
    %c0_i32_0 = arith.constant 0 : i32
    %c0_i32_1 = arith.constant 0 : i32
    return %c0_i32, %c0_i32_0 : i32, i32
  }
  func.func @transform_3(%arg0: i32) -> (i32, i32) {
    %c0_i32 = arith.constant 0 : i32
    %c0_i32_0 = arith.constant 0 : i32
    %c0_i32_1 = arith.constant 0 : i32
    return %c0_i32, %c0_i32_0 : i32, i32
  }
  func.func @transform_4(%arg0: i32) -> (i32, i32) {
    %c0_i32 = arith.constant 0 : i32
    %c0_i32_0 = arith.constant 0 : i32
    %c0_i32_1 = arith.constant 0 : i32
    return %c0_i32, %c0_i32_0 : i32, i32
  }
  func.func @transform_5(%arg0: i32) -> (i32, i32) {
    %c0_i32 = arith.constant 0 : i32
    %c0_i32_0 = arith.constant 0 : i32
    %c0_i32_1 = arith.constant 0 : i32
    return %c0_i32, %c0_i32_0 : i32, i32
  }
  func.func @transform_6(%arg0: i32) -> (i32, i32) {
    %c0_i32 = arith.constant 0 : i32
    %c0_i32_0 = arith.constant 0 : i32
    %c0_i32_1 = arith.constant 0 : i32
    return %c0_i32, %c0_i32_0 : i32, i32
  }
  func.func @transform_7(%arg0: i32) -> (i32, i32) {
    %c0_i32 = arith.constant 0 : i32
    %c0_i32_0 = arith.constant 0 : i32
    return %c0_i32, %arg0 : i32, i32
  }
}

</mosaic_0001>

<bundles_post_ra>
// kernel: value_net_forward.1
= control target key start
LH: loop header
LB: loop body
LE: loop exit
PB: predicated region body
PF: predicated region fallthrough
CT: control target
= control target key end

     0   :  { %vm56_vm0 = vcmask 130048   ;;  %v458_v3 = vmov 0   ;;  %vm186_vm1 = vcmask 261120   ;;  %v459_v36 = vmov 0.0   ;;  %s573_s0 = inlined_call_operand.vmem [shape: f32[16,8], index: 0, kind: input, shape index: {}]   ;;  %s574_s1 = inlined_call_operand.vmem [shape: f32[32,16], index: 1, kind: input, shape index: {}]   ;;  %s575_s2 = inlined_call_operand.vmem [shape: f32[32,1], index: 2, kind: input, shape index: {}]   ;;  %s576_s4 = inlined_call_operand.vmem [shape: f32[32,1], index: 4, kind: input, shape index: {}]   ;;  %s577_s6 = inlined_call_operand.vmem [shape: f32[8,1], index: 6, kind: input, shape index: {}]   ;;  %s578_s3 = inlined_call_operand.vmem [shape: f32[32,32], index: 3, kind: input, shape index: {}]   ;;  %s579_s5 = inlined_call_operand.vmem [shape: f32[8,32], index: 5, kind: input, shape index: {}]   ;;  %s580_s7 = inlined_call_operand.vmem [shape: f32[8,8], index: 7, kind: output, shape index: {}]  }
   0x1   :  { %v27_v0 = vld [vmem:[%s573_s0 + $0x8] sm:$0xff]  ;;  %v26_v1 = vld [vmem:[%s573_s0] sm:$0xff]  ;;  %440 = vset.pattern.permute.xlu0 %v458_v3  ;;  %441 = vset.pattern.permute.xlu1 %v458_v3  ;;  %v35_v5 = vld [vmem:[%s575_s2 + $0x18] sm:$0xff]  ;;  %vm460_vm2 = vmmov 0   ;;  %vm368_vm3 = vcmask 64512  }
   0x2   :  { %v28_v2 = vld [vmem:[%s574_s1] sm:$0xff]  ;;  %402 = vmatprep.subr.mxu0 %v27_v0  ;;  %v29_v4 = vld [vmem:[%s574_s1 + $0x8] sm:$0xff]  ;;  %v30_v6 = vld [vmem:[%s574_s1 + $0x10] sm:$0xff]  ;;  %53 = vperm.xlu0 %440, %v35_v5  }
   0x3   :  { %406 = vmatprep.mubr.msk.f32.mxu0 %vm56_vm0, %v28_v2  ;;  %403 = vmatpush3.msra.mxu0 %v27_v0  ;;  %v33_v7 = vld [vmem:[%s575_s2 + $0x8] sm:$0xff]  ;;  %v34_v8 = vld [vmem:[%s575_s2 + $0x10] sm:$0xff]  ;;  %v32_v9 = vld [vmem:[%s575_s2] sm:$0xff] }
   0x4   :  { %404 = vmatprep.subr.mxu0 %v26_v1  ;;  %43 = vperm.xlu1 %441, %v33_v7   ;;  %v31_v10 = vld [vmem:[%s574_s1 + $0x18] sm:$0xff]  ;;  %v164_v12 = vld [vmem:[%s576_s4 + $0x10] sm:$0xff]  ;;  %v163_v13 = vld [vmem:[%s576_s4 + $0x8] sm:$0xff] }
   0x5   :  { %405 = vmatpush3.msra.mxu0 %v26_v1  ;;  %v165_v11 = vld [vmem:[%s576_s4 + $0x18] sm:$0xff]  ;;  %v162_v14 = vld [vmem:[%s576_s4] sm:$0xff]  ;;  %v159_v33 = vld [vmem:[%s578_s3 + $0x8] sm:$0xff] }
   0x6   :  { %407 = vmatmul.mubr.msk.f32.vlgmr.msra.gmra.mxu0 %vm56_vm0, %v29_v4  ;;  %48 = vperm.xlu0 %440, %v34_v8   ;;  %v289_v15 = vld [vmem:[%s577_s6] sm:$0xff]  ;;  %v160_v34 = vld [vmem:[%s578_s3 + $0x10] sm:$0xff]  ;;  %v161_v35 = vld [vmem:[%s578_s3 + $0x18] sm:$0xff] }
   0x7   :  { %409 = vmatprep.mubr.msk.f32.mxu0 %vm56_vm0, %v30_v6  ;;  %v158_v16 = vld [vmem:[%s578_s3] sm:$0xff]  ;;  %426 = vmatprep.subr.mxu0 %v459_v36 }
   0x8   :  { %38 = vperm.xlu1 %441, %v32_v9   ;;  %420 = vmatprep.mubr.msk.f32.mxu1 %vm186_vm1, %v158_v16  ;;  %v288_v52 = vld [vmem:[%s579_s5] sm:$0xff] }
   0xa   :  { %410 = vmatmul.mubr.msk.f32.gmra.mxu0 %vm56_vm0, %v31_v10  ;;  %183 = vperm.xlu0 %440, %v165_v11  }
   0xb   :  { %434 = vmatprep.mubr.msk.f32.mxu0 %vm460_vm2, %v459_v36 }
   0xc   :  { %178 = vperm.xlu1 %441, %v164_v12  }
   0xe   :  { %173 = vperm.xlu0 %440, %v163_v13  }
  0x10   :  { %168 = vperm.xlu1 %441, %v162_v14  }
  0x12   :  { %292 = vperm.xlu0 %440, %v289_v15  }
  0x7d   :  { %v54_v17 = vpop.permute.xlu0 %53 }
  0x7f   :  { %v44_v19 = vpop.permute.xlu1 %43 }
  0x81   :  { %v49_v23 = vpop.permute.xlu0 %48 }
  0x83   :  { %v39_v27 = vpop.permute.xlu1 %38 }
  0x85   :  { %v184_v37 = vpop.permute.xlu0 %183 }
  0x87   :  { %v179_v39 = vpop.permute.xlu1 %178 }
  0x89   :  { %v174_v43 = vpop.permute.xlu0 %173 }
  0x8b   :  { %v169_v47 = vpop.permute.xlu1 %168 }
  0x8d   :  { %v293_v54 = vpop.permute.xlu0 %292 }
  0xc6   :  { %v408_v18 = vpop.f32.mrf.mxu0 }
  0xc7   :  { %v141_v25 = vadd.f32 %v408_v18, %v44_v19 }
  0xc8   :  { %v135_v20 = vpop.f32.mrf.mxu0 }
  0xc9   :  { %v136_v28 = vadd.f32 %v135_v20, %v39_v27 }
  0xca   :  { %v411_v21 = vpop.f32.mrf.mxu0 }
  0xcb   :  { %v151_v22 = vadd.f32 %v411_v21, %v54_v17 }
  0xcc   :  { %v145_v24 = vpop.f32.mrf.mxu0 }
  0xcd   :  { %442 = vtanh.f32 %v151_v22  ;;  %v146_v26 = vadd.f32 %v145_v24, %v49_v23 }
  0xcf   :  { %444 = vtanh.f32 %v146_v26 }
  0xd0   :  { %446 = vtanh.f32 %v141_v25 }
  0xd1   :  { %448 = vtanh.f32 %v136_v28 }
  0xda   :  { %v443_v29 = vpop.eup %442 }
  0xdb   :  { %412 = vmatprep.subr.mxu1 %v443_v29 }
  0xdc   :  { %v445_v30 = vpop.eup %444  ;;  %413 = vmatpush3.msra.mxu1 %v443_v29 }
  0xdd   :  { %414 = vmatprep.subr.mxu1 %v445_v30  ;;  %v447_v31 = vpop.eup %446 }
  0xde   :  { %415 = vmatpush3.msra.mxu1 %v445_v30  ;;  %v449_v32 = vpop.eup %448 }
  0xdf   :  { %416 = vmatprep.subr.mxu1 %v447_v31 }
  0xe0   :  { %417 = vmatpush3.msra.mxu1 %v447_v31 }
  0xe1   :  { %418 = vmatprep.subr.mxu1 %v449_v32 }
  0xe2   :  { %419 = vmatpush3.msra.mxu1 %v449_v32 }
  0xe3   :  { %421 = vmatmul.mubr.msk.f32.vlgmr.msra.gmra.mxu1 %vm186_vm1, %v159_v33 }
  0xe4   :  { %423 = vmatprep.mubr.msk.f32.mxu1 %vm186_vm1, %v160_v34 }
  0xe7   :  { %424 = vmatmul.mubr.msk.f32.gmra.mxu1 %vm186_vm1, %v161_v35 }
 0x1a3   :  { %v422_v38 = vpop.f32.mrf.mxu1 }
 0x1a4   :  { %v271_v45 = vadd.f32 %v422_v38, %v174_v43 }
 0x1a5   :  { %v265_v40 = vpop.f32.mrf.mxu1 }
 0x1a6   :  { %v266_v48 = vadd.f32 %v265_v40, %v169_v47 }
 0x1a7   :  { %v425_v41 = vpop.f32.mrf.mxu1 }
 0x1a8   :  { %v281_v42 = vadd.f32 %v425_v41, %v184_v37 }
 0x1a9   :  { %v275_v44 = vpop.f32.mrf.mxu1 }
 0x1aa   :  { %450 = vtanh.f32 %v281_v42  ;;  %v276_v46 = vadd.f32 %v275_v44, %v179_v39 }
 0x1ac   :  { %452 = vtanh.f32 %v276_v46 }
 0x1ad   :  { %454 = vtanh.f32 %v271_v45 }
 0x1ae   :  { %456 = vtanh.f32 %v266_v48 }
 0x1b7   :  { %v451_v49 = vpop.eup %450 }
 0x1b8   :  { %427 = vmatpush3.msra.mxu0 %v451_v49 }
 0x1b9   :  { %v453_v50 = vpop.eup %452  ;;  %428 = vmatprep.subr.mxu0 %v459_v36 }
 0x1ba   :  { %429 = vmatpush3.msra.mxu0 %v453_v50  ;;  %v455_v51 = vpop.eup %454 }
 0x1bb   :  { %430 = vmatprep.subr.mxu0 %v459_v36  ;;  %v457_v53 = vpop.eup %456 }
 0x1bc   :  { %431 = vmatpush3.msra.mxu0 %v455_v51 }
 0x1bd   :  { %432 = vmatprep.subr.mxu0 %v459_v36 }
 0x1be   :  { %433 = vmatpush3.msra.mxu0 %v457_v53 }
 0x1bf   :  { %435 = vmatmul.mubr.msk.f32.vlgmr.msra.gmra.mxu0 %vm186_vm1, %v288_v52 }
 0x27f   :  { %v364_v55 = vpop.f32.mrf.mxu0 }
 0x280   :  { %v365_v56 = vadd.f32 %v364_v55, %v293_v54 }
 0x281   :  { %v436_v57 = vpop.f32.mrf.mxu0 }
 0x282   :  { %369 = vst.msk [vmem:[%s580_s7] sm:$0xff] %vm368_vm3, %v365_v56 }

</bundles_post_ra>
